<compile_context>
chip_gen: v6e
topology: v6e:2x2x1
jax: 0.10.0
libtpu: 0.0.40
codegen_flags: <defaults>
</compile_context>

<pallas_src>
import functools

import jax
import jax.numpy as jnp
from jax.experimental import pallas as pl
from jax.experimental.pallas import tpu as pltpu


def _cdiv(a, b):
    return -(-a // b)


def _r2_sums_kernel(y_pred_ref, y_true_ref, s1_ref, s2_ref, sr_ref, *,
                    n_rows, n_tile, steps_per_split, uniform):
    """Accumulates per-lane sum(y), sum(y^2), sum((y - yp)^2) into the outputs."""
    n = pl.program_id(1)

    @pl.when(n == 0)
    def _init():
        s1_ref[...] = jnp.zeros_like(s1_ref)
        s2_ref[...] = jnp.zeros_like(s2_ref)
        sr_ref[...] = jnp.zeros_like(sr_ref)

    yt_raw = y_true_ref[...]
    yp_raw = y_pred_ref[...]

    def _accum(yt, yp):
        yt = yt.astype(jnp.float32)
        yp = yp.astype(jnp.float32)
        diff = yt - yp
        # TODO(synk): on v7x bf16 these column sums could be offloaded to the
        # idle MXU (ones @ x) to relieve the VALU slot; kept on VPU for precision.
        s1_ref[...] += jnp.sum(yt, axis=0, keepdims=True)[None]
        s2_ref[...] += jnp.sum(yt * yt, axis=0, keepdims=True)[None]
        sr_ref[...] += jnp.sum(diff * diff, axis=0, keepdims=True)[None]

    if uniform:
        # Every tile is full and in-bounds: zero masking on the hot path.
        _accum(yt_raw, yp_raw)
    else:
        row_start = (pl.program_id(0) * steps_per_split + n) * n_tile
        is_full = row_start + n_tile <= n_rows

        @pl.when(is_full)
        def _full_tile():
            _accum(yt_raw, yp_raw)

        @pl.when(jnp.logical_not(is_full))
        def _partial_tile():
            # Mask invalid rows BEFORE any arithmetic so OOB garbage (possibly
            # NaN/Inf bit patterns) never reaches the f32 accumulators.
            row = jax.lax.broadcasted_iota(jnp.int32, yt_raw.shape, 0) + row_start
            valid = row < n_rows                       # int32 vs int32 compare
            zero = jnp.zeros((), dtype=yt_raw.dtype)
            _accum(jnp.where(valid, yt_raw, zero), jnp.where(valid, yp_raw, zero))


def _plan_tiles(n_rows, width, itemsize, max_rows_per_tile=None):
    """Pick (row_splits, steps_per_split, row_tile, vmem_limit_bytes)."""
    sublane = max(8, (8 * 4) // itemsize)            # 8 rows f32, 16 rows bf16
    try:
        vmem_cap = int(pltpu.get_tpu_info().vmem_capacity_bytes)
    except Exception:                                # pragma: no cover - fallback
        vmem_cap = 64 * 1024 * 1024                  # v7x per-TC capacity
    # ~48 MiB of pipeline buffers on 128 MiB parts, ~40 MiB on v7x (64 MiB/TC).
    vmem_limit = min((vmem_cap * 3) // 4, 56 * 1024 * 1024)
    budget = max(vmem_limit - 8 * 1024 * 1024, 2 * 1024 * 1024)

    max_rows = budget // (4 * width * itemsize)      # 2 inputs x 2 pipeline bufs
    if max_rows_per_tile is not None:
        max_rows = min(max_rows, max_rows_per_tile)
    max_rows = max(max_rows, sublane)
    # TODO(synk): feature widths so large that `sublane` rows overflow VMEM
    # would need a feature-tiled grid; not expected for this loss.

    # Split the row range across TensorCores (v7x megacore: 2 TCs); on 1-TC
    # chips this is just one extra benign outer-loop iteration.
    n_splits = 2 if n_rows >= 2 * sublane else 1
    rows_per_split = _cdiv(n_rows, n_splits)
    steps_per_split = max(1, _cdiv(rows_per_split, max_rows))

    if n_splits == 1 and steps_per_split == 1:
        row_tile = n_rows                            # single full-batch block
    else:
        row_tile = _cdiv(rows_per_split, steps_per_split)
        row_tile = _cdiv(row_tile, sublane) * sublane
    return n_splits, steps_per_split, row_tile, vmem_limit


def r_square_loss_pallas(y_pred, y_true, overflow=1e-6, reduction="mean",
                         max_rows_per_tile=None):
    """Pallas TPU implementation of r_square_loss.forward.

    Supports reduction in {'mean', 'sum', 'none'} and float32/bfloat16 inputs
    (accumulation is always in float32).
    """
    assert y_pred.shape == y_true.shape and y_true.ndim == 2
    assert reduction in ("mean", "sum", "none")
    N, F = y_true.shape
    itemsize = jnp.dtype(y_true.dtype).itemsize

    # Fold rows into lanes for skinny features (zero-copy row-major reshape).
    k = 1
    if F < 128 and 128 % F == 0:
        cand = 128 // F
        if N % cand == 0:
            k = cand
    R, W = N // k, k * F
    if k > 1:
        y_pred = y_pred.reshape(R, W)
        y_true = y_true.reshape(R, W)

    n_splits, n_tile, vmem_limit = None, None, None
    n_splits, steps_per_split, n_tile, vmem_limit = _plan_tiles(
        R, W, itemsize, max_rows_per_tile)

    total_tiles = n_splits * steps_per_split
    num_valid_tiles = _cdiv(R, n_tile)
    uniform = (total_tiles * n_tile == R)

    if total_tiles > num_valid_tiles:
        # Rectangular grid has a few surplus tiles: clamp their block index to
        # stay in-bounds; their contribution is zeroed by the in-kernel mask.
        def in_map(c, n):
            return (jnp.minimum(c * steps_per_split + n, num_valid_tiles - 1), 0)
    else:
        def in_map(c, n):
            return (c * steps_per_split + n, 0)

    in_spec = pl.BlockSpec((n_tile, W), in_map)
    out_spec = pl.BlockSpec((1, 1, W), lambda c, n: (c, 0, 0))
    sum_shape = jax.ShapeDtypeStruct((n_splits, 1, W), jnp.float32)

    kernel = functools.partial(
        _r2_sums_kernel, n_rows=R, n_tile=n_tile,
        steps_per_split=steps_per_split, uniform=uniform)

    cost = pl.CostEstimate(
        flops=int(8 * N * F),
        transcendentals=0,
        bytes_accessed=int(2 * N * F * itemsize + 3 * n_splits * W * 4))

    s1p, s2p, srp = pl.pallas_call(
        kernel,
        out_shape=(sum_shape, sum_shape, sum_shape),
        grid_spec=pltpu.PrefetchScalarGridSpec(
            num_scalar_prefetch=0,
            grid=(n_splits, steps_per_split),
            in_specs=[in_spec, in_spec],
            out_specs=(out_spec, out_spec, out_spec),
        ),
        compiler_params=pltpu.CompilerParams(
            dimension_semantics=("parallel", "arbitrary"),
            vmem_limit_bytes=int(vmem_limit)),
        cost_estimate=cost,
    )(y_pred, y_true)

    # Combine per-split / per-lane-group partial sums and finalize r2 (tiny).
    def _combine(p):
        return p.sum(axis=(0, 1)).reshape(k, F).sum(axis=0)

    s1, s2, sr = _combine(s1p), _combine(s2p), _combine(srp)
    n_f = jnp.float32(N)
    # TODO(synk): single-pass ss_tot is cancellation-prone when |mean| >> std;
    # a per-feature shift (e.g. by the first row) would fix it if ever needed.
    ss_tot = s2 - s1 * s1 / n_f
    r2 = sr / (ss_tot + jnp.float32(overflow))

    if reduction == "mean":
        return jnp.mean(r2)
    if reduction == "sum":
        return jnp.sum(r2)
    return r2


def _r_square_loss_ref(y_pred, y_true, overflow=1e-6, reduction="mean"):
    means = jnp.mean(y_true, axis=0)
    ss_tot = jnp.sum((y_true - means) ** 2, axis=0)
    ss_res = jnp.sum((y_true - y_pred) ** 2, axis=0)
    r2 = ss_res / (ss_tot + overflow)
    if reduction == "mean":
        return jnp.mean(r2)
    if reduction == "sum":
        return jnp.sum(r2)
    return r2


if __name__ == "__main__":
    key = jax.random.PRNGKey(0)
    k1, k2, k3, k4, k5, k6 = jax.random.split(key, 6)

    # Case 1: skinny features -> row->lane folding path. batch=8, features=32.
    N, F = 8, 32
    y_true = jax.random.normal(k1, (N, F), dtype=jnp.float32)
    y_pred = y_true + 0.1 * jax.random.normal(k2, (N, F), dtype=jnp.float32)
    for reduction in ("mean", "sum", "none"):
        out = jax.block_until_ready(
            r_square_loss_pallas(y_pred, y_true, reduction=reduction))
        ref = _r_square_loss_ref(y_pred, y_true, reduction=reduction)
        assert jnp.allclose(out, ref, rtol=1e-4, atol=1e-6), (reduction, out, ref)

    # Case 2: non-multiple-of-128 features, tiled rows, row split across cores,
    # masked partial tile and clamped surplus tile.
    N2, F2 = 20, 96
    y_true2 = jax.random.normal(k3, (N2, F2), dtype=jnp.float32)
    y_pred2 = y_true2 + 0.1 * jax.random.normal(k4, (N2, F2), dtype=jnp.float32)
    out2 = jax.block_until_ready(
        r_square_loss_pallas(y_pred2, y_true2, reduction="mean", max_rows_per_tile=8))
    ref2 = _r_square_loss_ref(y_pred2, y_true2, reduction="mean")
    assert jnp.allclose(out2, ref2, rtol=1e-4, atol=1e-6), (out2, ref2)

    # Case 3: bfloat16 inputs (dtype-aware sublane alignment, f32 accumulation).
    N3, F3 = 64, 32
    y_true3 = jax.random.normal(k5, (N3, F3), dtype=jnp.float32).astype(jnp.bfloat16)
    y_pred3 = (y_true3.astype(jnp.float32)
               + 0.1 * jax.random.normal(k6, (N3, F3), dtype=jnp.float32)
               ).astype(jnp.bfloat16)
    out3 = jax.block_until_ready(
        r_square_loss_pallas(y_pred3, y_true3, reduction="mean"))
    ref3 = _r_square_loss_ref(y_pred3.astype(jnp.float32),
                              y_true3.astype(jnp.float32), reduction="mean")
    assert jnp.allclose(out3, ref3, rtol=2e-3, atol=1e-4), (out3, ref3)

    print("KERNEL_OK")
</pallas_src>

<mosaic_0001>
module attributes {stable_mosaic.version = 11 : i64} {
  func.func @_r2_sums_kernel(%arg0: i32, %arg1: i32, %arg2: memref<2x128xf32, #tpu.memory_space<vmem>>, %arg3: memref<2x128xf32, #tpu.memory_space<vmem>>, %arg4: memref<1x1x128xf32, #tpu.memory_space<vmem>>, %arg5: memref<1x1x128xf32, #tpu.memory_space<vmem>>, %arg6: memref<1x1x128xf32, #tpu.memory_space<vmem>>) attributes {dimension_semantics = [#tpu.dimension_semantics<parallel>, #tpu.dimension_semantics<arbitrary>], iteration_bounds = array<i64: 1, 1>, scalar_prefetch = 0 : i64, scratch_operands = 0 : i64, tpu.core_type = #tpu.core_type<tc>, window_params = [{transform_indices = @transform_0, window_bounds = array<i64: 2, 128>}, {transform_indices = @transform_1, window_bounds = array<i64: 2, 128>}, {transform_indices = @transform_2, window_bounds = array<i64: 1, 1, 128>}, {transform_indices = @transform_3, window_bounds = array<i64: 1, 1, 128>}, {transform_indices = @transform_4, window_bounds = array<i64: 1, 1, 128>}]} {
    %c0_i32 = arith.constant 0 : i32
    %0 = arith.cmpi eq, %arg1, %c0_i32 : i32
    %1 = arith.extui %0 : i1 to i32
    %c0_i32_0 = arith.constant 0 : i32
    %2 = arith.cmpi ne, %1, %c0_i32_0 : i32
    scf.if %2 {
      %cst_24 = arith.constant 0.000000e+00 : f32
      %26 = vector.broadcast %cst_24 : f32 to vector<1x1x128xf32>
      %c0_25 = arith.constant 0 : index
      %c0_26 = arith.constant 0 : index
      %c0_27 = arith.constant 0 : index
      %27 = vector.load %arg4[%c0_25, %c0_26, %c0_27] : memref<1x1x128xf32, #tpu.memory_space<vmem>>, vector<1x1x128xf32>
      tpu.vector_store %arg4[%c0_25, %c0_26, %c0_27], %26 {strides = array<i32>} : memref<1x1x128xf32, #tpu.memory_space<vmem>>, vector<1x1x128xf32>,
      %cst_28 = arith.constant 0.000000e+00 : f32
      %28 = vector.broadcast %cst_28 : f32 to vector<1x1x128xf32>
      %c0_29 = arith.constant 0 : index
      %c0_30 = arith.constant 0 : index
      %c0_31 = arith.constant 0 : index
      %29 = vector.load %arg5[%c0_29, %c0_30, %c0_31] : memref<1x1x128xf32, #tpu.memory_space<vmem>>, vector<1x1x128xf32>
      tpu.vector_store %arg5[%c0_29, %c0_30, %c0_31], %28 {strides = array<i32>} : memref<1x1x128xf32, #tpu.memory_space<vmem>>, vector<1x1x128xf32>,
      %cst_32 = arith.constant 0.000000e+00 : f32
      %30 = vector.broadcast %cst_32 : f32 to vector<1x1x128xf32>
      %c0_33 = arith.constant 0 : index
      %c0_34 = arith.constant 0 : index
      %c0_35 = arith.constant 0 : index
      %31 = vector.load %arg6[%c0_33, %c0_34, %c0_35] : memref<1x1x128xf32, #tpu.memory_space<vmem>>, vector<1x1x128xf32>
      tpu.vector_store %arg6[%c0_33, %c0_34, %c0_35], %30 {strides = array<i32>} : memref<1x1x128xf32, #tpu.memory_space<vmem>>, vector<1x1x128xf32>,
    } else {
    }
    %c0 = arith.constant 0 : index
    %c0_1 = arith.constant 0 : index
    %3 = vector.load %arg3[%c0, %c0_1] : memref<2x128xf32, #tpu.memory_space<vmem>>, vector<2x128xf32>
    %c0_2 = arith.constant 0 : index
    %c0_3 = arith.constant 0 : index
    %4 = vector.load %arg2[%c0_2, %c0_3] : memref<2x128xf32, #tpu.memory_space<vmem>>, vector<2x128xf32>
    %5 = arith.subf %3, %4 : vector<2x128xf32>
    %c0_4 = arith.constant 0 : index
    %c0_5 = arith.constant 0 : index
    %c0_6 = arith.constant 0 : index
    %6 = vector.load %arg4[%c0_4, %c0_5, %c0_6] : memref<1x1x128xf32, #tpu.memory_space<vmem>>, vector<1x1x128xf32>
    %cst = arith.constant dense<0.000000e+00> : vector<128xf32>
    %7 = vector.multi_reduction <add>, %3, %cst [0] : vector<2x128xf32> to vector<128xf32>
    %8 = vector.shape_cast %7 : vector<128xf32> to vector<1x128xf32>
    %9 = vector.shape_cast %8 : vector<1x128xf32> to vector<1x1x128xf32>
    %10 = arith.addf %6, %9 : vector<1x1x128xf32>
    %c0_7 = arith.constant 0 : index
    %c0_8 = arith.constant 0 : index
    %c0_9 = arith.constant 0 : index
    %11 = vector.load %arg4[%c0_7, %c0_8, %c0_9] : memref<1x1x128xf32, #tpu.memory_space<vmem>>, vector<1x1x128xf32>
    tpu.vector_store %arg4[%c0_7, %c0_8, %c0_9], %10 {strides = array<i32>} : memref<1x1x128xf32, #tpu.memory_space<vmem>>, vector<1x1x128xf32>,
    %c0_10 = arith.constant 0 : index
    %c0_11 = arith.constant 0 : index
    %c0_12 = arith.constant 0 : index
    %12 = vector.load %arg5[%c0_10, %c0_11, %c0_12] : memref<1x1x128xf32, #tpu.memory_space<vmem>>, vector<1x1x128xf32>
    %13 = arith.mulf %3, %3 : vector<2x128xf32>
    %cst_13 = arith.constant dense<0.000000e+00> : vector<128xf32>
    %14 = vector.multi_reduction <add>, %13, %cst_13 [0] : vector<2x128xf32> to vector<128xf32>
    %15 = vector.shape_cast %14 : vector<128xf32> to vector<1x128xf32>
    %16 = vector.shape_cast %15 : vector<1x128xf32> to vector<1x1x128xf32>
    %17 = arith.addf %12, %16 : vector<1x1x128xf32>
    %c0_14 = arith.constant 0 : index
    %c0_15 = arith.constant 0 : index
    %c0_16 = arith.constant 0 : index
    %18 = vector.load %arg5[%c0_14, %c0_15, %c0_16] : memref<1x1x128xf32, #tpu.memory_space<vmem>>, vector<1x1x128xf32>
    tpu.vector_store %arg5[%c0_14, %c0_15, %c0_16], %17 {strides = array<i32>} : memref<1x1x128xf32, #tpu.memory_space<vmem>>, vector<1x1x128xf32>,
    %c0_17 = arith.constant 0 : index
    %c0_18 = arith.constant 0 : index
    %c0_19 = arith.constant 0 : index
    %19 = vector.load %arg6[%c0_17, %c0_18, %c0_19] : memref<1x1x128xf32, #tpu.memory_space<vmem>>, vector<1x1x128xf32>
    %20 = arith.mulf %5, %5 : vector<2x128xf32>
    %cst_20 = arith.constant dense<0.000000e+00> : vector<128xf32>
    %21 = vector.multi_reduction <add>, %20, %cst_20 [0] : vector<2x128xf32> to vector<128xf32>
    %22 = vector.shape_cast %21 : vector<128xf32> to vector<1x128xf32>
    %23 = vector.shape_cast %22 : vector<1x128xf32> to vector<1x1x128xf32>
    %24 = arith.addf %19, %23 : vector<1x1x128xf32>
    %c0_21 = arith.constant 0 : index
    %c0_22 = arith.constant 0 : index
    %c0_23 = arith.constant 0 : index
    %25 = vector.load %arg6[%c0_21, %c0_22, %c0_23] : memref<1x1x128xf32, #tpu.memory_space<vmem>>, vector<1x1x128xf32>
    tpu.vector_store %arg6[%c0_21, %c0_22, %c0_23], %24 {strides = array<i32>} : memref<1x1x128xf32, #tpu.memory_space<vmem>>, vector<1x1x128xf32>,
    return
  }
  func.func @transform_0(%arg0: i32, %arg1: i32) -> (i32, i32) {
    %c1_i32 = arith.constant 1 : i32
    %0 = arith.muli %arg0, %c1_i32 : i32
    %1 = arith.addi %0, %arg1 : i32
    %c0_i32 = arith.constant 0 : i32
    %c0_i32_0 = arith.constant 0 : i32
    return %1, %c0_i32 : i32, i32
  }
  func.func @transform_1(%arg0: i32, %arg1: i32) -> (i32, i32) {
    %c1_i32 = arith.constant 1 : i32
    %0 = arith.muli %arg0, %c1_i32 : i32
    %1 = arith.addi %0, %arg1 : i32
    %c0_i32 = arith.constant 0 : i32
    %c0_i32_0 = arith.constant 0 : i32
    return %1, %c0_i32 : i32, i32
  }
  func.func @transform_2(%arg0: i32, %arg1: i32) -> (i32, i32, i32) {
    %c0_i32 = arith.constant 0 : i32
    %c0_i32_0 = arith.constant 0 : i32
    %c0_i32_1 = arith.constant 0 : i32
    return %arg0, %c0_i32, %c0_i32_0 : i32, i32, i32
  }
  func.func @transform_3(%arg0: i32, %arg1: i32) -> (i32, i32, i32) {
    %c0_i32 = arith.constant 0 : i32
    %c0_i32_0 = arith.constant 0 : i32
    %c0_i32_1 = arith.constant 0 : i32
    return %arg0, %c0_i32, %c0_i32_0 : i32, i32, i32
  }
  func.func @transform_4(%arg0: i32, %arg1: i32) -> (i32, i32, i32) {
    %c0_i32 = arith.constant 0 : i32
    %c0_i32_0 = arith.constant 0 : i32
    %c0_i32_1 = arith.constant 0 : i32
    return %arg0, %c0_i32, %c0_i32_0 : i32, i32, i32
  }
}

</mosaic_0001>

<bundles_post_ra>
// kernel: tpu_custom_call.1
= control target key start
LH: loop header
LB: loop body
LE: loop exit
PB: predicated region body
PF: predicated region fallthrough
CT: control target
= control target key end

     0   :  { %10 = vsyncpa [#allocation3], 0  ;;  %s294_s0 = inlined_call_operand.hbm [shape: f32[2,128], index: 0, kind: input, shape index: {}]   ;;  %s295_s1 = inlined_call_operand.hbm [shape: f32[2,128], index: 1, kind: input, shape index: {}]   ;;  %s296_s2 = inlined_call_operand.hbm [shape: f32[1,1,128], index: 2, kind: output, shape index: {0}]   ;;  %s297_s3 = inlined_call_operand.hbm [shape: f32[1,1,128], index: 3, kind: output, shape index: {1}]   ;;  %s298_s4 = inlined_call_operand.hbm [shape: f32[1,1,128], index: 4, kind: output, shape index: {2}]  }
   0x1   :  { %11 = vsyncpa [#allocation6], 0 }
   0x2   :  { %12 = vsyncpa [#allocation4], 0 }
   0x3   :  { %13 = vsyncpa [#allocation9], 0  ;;  %s248_s15 = smov [#allocation2]   ;;  %s249_s17 = smov [#allocation5]  }
   0x4   :  { %s23_s16 = sshll.u32 %s248_s15, 4  ;;  %s36_s18 = sshll.u32 %s249_s17, 4  ;;  %s24_s16 = int_to_ptr.vmem [resolvable:$true] %s23_s16  ;;  %s37_s18 = int_to_ptr.vmem [resolvable:$true] %s36_s18 }
   0x5   :  { %s148_s19 = scalar_lea.vmem %s24_s16, 32  ;;  %p153_p1 = scmp.lt.s32.totalorder %s24_s16, %s24_s16 }
   0x6   :  { %p149_p0 = scmp.ne.s32.totalorder %s24_s16, %s148_s19  ;;  %p154_p2 = scmp.lt.s32.totalorder %s148_s19, %s148_s19 }
   0x8   :  { %p155_p3 = por %p154_p2, %p153_p1 }
   0xa   :  { %p156_p4 = pnand %p155_p3, %p149_p0 }
   0xc   :  { %159 = shalt.err (!%p156_p4)
}
   0xd   :  { %26 = dma.hbm_to_vmem [thread:$0]  %s294_s0, 32, %s24_s16, [#allocation3]  }
   0xe   :  { %s168_s22 = scalar_lea.vmem %s37_s18, 32  ;;  %p173_p6 = scmp.lt.s32.totalorder %s37_s18, %s37_s18 }
   0xf   :  { %p169_p5 = scmp.ne.s32.totalorder %s37_s18, %s168_s22  ;;  %p174_p7 = scmp.lt.s32.totalorder %s168_s22, %s168_s22 }
  0x11   :  { %p175_p8 = por %p174_p7, %p173_p6 }
  0x13   :  { %p176_p9 = pnand %p175_p8, %p169_p5 }
  0x15   :  { %179 = shalt.err (!%p176_p9)
}
  0x16   :  { %39 = dma.hbm_to_vmem [thread:$0]  %s295_s1, 32, %s37_s18, [#allocation6]  }
  0x17   :  { %240 = dma.done.wait [#allocation3], 32  }
  0x18   :  { %241 = vsyncadd [#allocation3], 4294967264 }
  0x19   :  { %242 = dma.done.wait [#allocation6], 32  }
  0x1a   :  { %243 = vsyncadd [#allocation6], 4294967264  ;;  %v250_v0 = vmov 0.0   ;;  %vm59_vm0 = vcmask 1041408   ;;  %v55_v1 = vld [vmem:[#allocation5] sm:$0x3] }
  0x1b   :  { %53 = vst [vmem:[#allocation8] sm:$0x1] %v250_v0  ;;  %52 = vst [vmem:[#allocation7] sm:$0x1] %v250_v0  ;;  %v56_v2 = vld [vmem:[#allocation2] sm:$0x3]  ;;  %v70_v3 = vmul.f32 %v55_v1, %v55_v1 }
  0x1c   :  { %54 = vst [vmem:[#allocation10] sm:$0x1] %v250_v0  ;;  %v60_v4 = vsel %vm59_vm0, %v55_v1, 0.0  ;;  %v57_v5 = vsub.f32 %v55_v1, %v56_v2  ;;  %s251_s0 = smov [#allocation7]   ;;  %s252_s25 = smov [#allocation8]  }
  0x1d   :  { %v61_v6 = vrot.slane %v60_v4, 4  ;;  %v71_v7 = vsel %vm59_vm0, %v70_v3, 0.0  ;;  %s97_s1 = sshll.u32 %s251_s0, 4  ;;  %s107_s26 = sshll.u32 %s252_s25, 4  ;;  %s98_s1 = int_to_ptr.vmem [resolvable:$true] %s97_s1  ;;  %s108_s26 = int_to_ptr.vmem [resolvable:$true] %s107_s26 }
  0x1e   :  { %v81_v8 = vmul.f32 %v57_v5, %v57_v5  ;;  %v72_v9 = vrot.slane %v71_v7, 4  ;;  %s253_s27 = smov [#allocation10]   ;;  %s180_s29 = scalar_lea.vmem %s98_s1, 16 }
  0x1f   :  { %v62_v10 = vadd.f32 %v61_v6, %v60_v4  ;;  %s117_s28 = sshll.u32 %s253_s27, 4  ;;  %p181_p10 = scmp.ne.s32.totalorder %s98_s1, %s180_s29  ;;  %s118_s28 = int_to_ptr.vmem [resolvable:$true] %s117_s28 }
  0x20   :  { %v82_v11 = vsel %vm59_vm0, %v81_v8, 0.0  ;;  %v73_v12 = vadd.f32 %v72_v9, %v71_v7  ;;  %s184_s30 = scalar_lea.vmem %s98_s1, 32  ;;  %p185_p11 = scmp.lt.s32.totalorder %s98_s1, %s98_s1 }
  0x21   :  { %v63_v13 = vrot.slane %v62_v10, 2  ;;  %v83_v14 = vrot.slane %v82_v11, 4  ;;  %p186_p12 = scmp.lt.s32.totalorder %s184_s30, %s180_s29 }
  0x22   :  { %v74_v15 = vrot.slane %v73_v12, 2  ;;  %v58_v21 = vld [vmem:[#allocation7] sm:$0x1]  ;;  %v69_v25 = vld [vmem:[#allocation8] sm:$0x1] }
  0x23   :  { %v64_v16 = vadd.f32 %v63_v13, %v62_v10  ;;  %v84_v17 = vadd.f32 %v83_v14, %v82_v11  ;;  %v80_v29 = vld [vmem:[#allocation10] sm:$0x1]  ;;  %p187_p13 = por %p186_p12, %p185_p11 }
  0x24   :  { %v75_v18 = vadd.f32 %v74_v15, %v73_v12 }
  0x25   :  { %v65_v19 = vrot.slane %v64_v16, 1  ;;  %v85_v20 = vrot.slane %v84_v17, 2  ;;  %p188_p0 = pnand %p187_p13, %p181_p10 }
  0x26   :  { %v76_v22 = vrot.slane %v75_v18, 1 }
  0x27   :  { %v66_v23 = vadd.f32 %v65_v19, %v64_v16  ;;  %v86_v24 = vadd.f32 %v85_v20, %v84_v17 }
  0x28   :  { %v77_v26 = vadd.f32 %v76_v22, %v75_v18 }
  0x29   :  { %v67_v27 = vadd.f32 %v66_v23, %v58_v21  ;;  %v87_v28 = vrot.slane %v86_v24, 1 }
  0x2a   :  { %v78_v30 = vadd.f32 %v77_v26, %v69_v25 }
  0x2b   :  { %68 = vst [vmem:[#allocation7] sm:$0x1] %v67_v27  ;;  %v88_v31 = vadd.f32 %v87_v28, %v86_v24 }
  0x2c   :  { %191 = shalt.err (!%p188_p0)
}
  0x2d   :  { %100 = dma.vmem_to_hbm [thread:$0]  %s98_s1, 16, %s296_s2, [#allocation4]   ;;  %79 = vst [vmem:[#allocation8] sm:$0x1] %v78_v30  ;;  %v89_v32 = vadd.f32 %v88_v31, %v80_v29 }
  0x2e   :  { %s200_s7 = scalar_lea.vmem %s108_s26, 16  ;;  %s204_s8 = scalar_lea.vmem %s108_s26, 32 }
  0x2f   :  { %p201_p1 = scmp.ne.s32.totalorder %s108_s26, %s200_s7  ;;  %p205_p2 = scmp.lt.s32.totalorder %s108_s26, %s108_s26 }
  0x30   :  { %p206_p3 = scmp.lt.s32.totalorder %s204_s8, %s200_s7 }
  0x32   :  { %p207_p4 = por %p206_p3, %p205_p2 }
  0x34   :  { %p208_p5 = pnand %p207_p4, %p201_p1 }
  0x36   :  { %211 = shalt.err (!%p208_p5)
}
  0x37   :  { %110 = dma.vmem_to_hbm [thread:$0]  %s108_s26, 16, %s297_s3, [#allocation9]   ;;  %90 = vst [vmem:[#allocation10] sm:$0x1] %v89_v32 }
  0x38   :  { %s220_s11 = scalar_lea.vmem %s118_s28, 16  ;;  %s224_s12 = scalar_lea.vmem %s118_s28, 32 }
  0x39   :  { %p221_p6 = scmp.ne.s32.totalorder %s118_s28, %s220_s11  ;;  %p225_p7 = scmp.lt.s32.totalorder %s118_s28, %s118_s28 }
  0x3a   :  { %p226_p8 = scmp.lt.s32.totalorder %s224_s12, %s220_s11 }
  0x3c   :  { %p227_p9 = por %p226_p8, %p225_p7 }
  0x3e   :  { %p228_p10 = pnand %p227_p9, %p221_p6 }
  0x40   :  { %231 = shalt.err (!%p228_p10)
}
  0x41   :  { %120 = dma.vmem_to_hbm [thread:$0]  %s118_s28, 16, %s298_s4, [#allocation9]  }
  0x42   :  { %244 = dma.done.wait [#allocation4], 16  }
  0x43   :  { %245 = vsyncadd [#allocation4], 4294967280 }
  0x44   :  { %246 = dma.done.wait [#allocation9], 32  }
  0x45   :  { %247 = vsyncadd [#allocation9], 4294967264 }
  0x46   :  { %130 = vsyncpa [#allocation3], 1 }
  0x47   :  { %131 = vsyncpa [#allocation6], 1 }
  0x48   :  { %132 = vsyncpa [#allocation4], 1 }
  0x49   :  { %133 = vsyncpa [#allocation9], 1 }

</bundles_post_ra>
